<compile_context>
chip_gen: v6e
topology: v6e:2x2x1
jax: 0.10.0
libtpu: 0.0.40
codegen_flags: <defaults>
</compile_context>

<pallas_src>
import jax
import jax.numpy as jnp
from jax.experimental import pallas as pl
from jax.experimental.pallas import tpu as pltpu

F_IN = 113


def _cdiv(a, b):
    return -(-a // b)


def _round_up(n, m):
    return _cdiv(n, m) * m


def mlp_kernel(x_ref, w1_ref, b1_ref, w2_ref, b2_ref, w3_ref, b3_ref,
               w4_ref, b4_ref, o_ref):
    # One batch tile per grid step: 3 MXU matmuls (f32 accumulation) + ReLUs; fc4 on the VPU/XLU.
    x = x_ref[...]                                                       # (tile_b, 113)
    h = jnp.dot(x, w1_ref[...], preferred_element_type=jnp.float32) + b1_ref[...]
    h = jnp.maximum(h, 0.0)
    h = jnp.dot(h, w2_ref[...], preferred_element_type=jnp.float32) + b2_ref[...]
    h = jnp.maximum(h, 0.0)
    h = jnp.dot(h, w3_ref[...], preferred_element_type=jnp.float32) + b3_ref[...]
    h = jnp.maximum(h, 0.0)
    # fc4: (tile_b, 32) * (1, 32) -> lane reduce; avoids an N=1, K=32 MXU pass entirely.
    out = jnp.sum(h * w4_ref[...], axis=-1, keepdims=True) + b4_ref[0, 0]
    o_ref[...] = out.astype(o_ref.dtype)


def sales_volume_predictor(x, params, *, max_tile_b=2048):
    """x: (B, 113) float32. params: dict of weights/biases. Returns (B, 1) float32."""
    B, F = x.shape
    assert F == F_IN, f"expected {F_IN} features, got {F}"

    w1, b1 = params["w1"], params["b1"]
    w2, b2 = params["w2"], params["b2"]
    w3, b3 = params["w3"], params["b3"]
    w4, b4 = params["w4"], params["b4"]
    w4_row = w4.reshape(1, w4.shape[0])          # (1, 32) row for the VPU reduce

    # Tile selection: big tiles to amortize per-step overhead, >= 2 tiles for v7x megacore,
    # and a ragged (masked) last tile instead of padding/copying the batch.
    if B <= 8:
        num_tiles, tile_b = 1, B                 # single full-extent block
    else:
        num_tiles = max(2, _cdiv(B, max_tile_b))
        tile_b = _round_up(_cdiv(B, num_tiles), 8)
        num_tiles = _cdiv(B, tile_b)             # drop any fully out-of-bounds trailing tile

    const2d = lambda i: (0, 0)  # weights/biases: same block every step -> stay VMEM-resident

    out = pl.pallas_call(
        mlp_kernel,
        out_shape=jax.ShapeDtypeStruct((B, 1), jnp.float32),
        grid=(num_tiles,),
        in_specs=[
            pl.BlockSpec((tile_b, F_IN), lambda i: (i, 0)),     # x tile (113 = full last dim)
            pl.BlockSpec(w1.shape, const2d),                    # (113, 128)
            pl.BlockSpec(b1.shape, const2d),                    # (1, 128)
            pl.BlockSpec(w2.shape, const2d),                    # (128, 64)
            pl.BlockSpec(b2.shape, const2d),                    # (1, 64)
            pl.BlockSpec(w3.shape, const2d),                    # (64, 32)
            pl.BlockSpec(b3.shape, const2d),                    # (1, 32)
            pl.BlockSpec(w4_row.shape, const2d),                # (1, 32)
            pl.BlockSpec(memory_space=pltpu.MemorySpace.SMEM),  # b4 scalar in SMEM
        ],
        out_specs=pl.BlockSpec((tile_b, 1), lambda i: (i, 0)),
        compiler_params=pltpu.CompilerParams(
            dimension_semantics=("parallel",),
            vmem_limit_bytes=32 * 1024 * 1024,
        ),
    )(x, w1, b1, w2, b2, w3, b3, w4_row, b4)

    return out


def init_params(key):
    """Deterministic parameter init mirroring the nn.Linear shapes.

    torch stores weight as (out, in); here we keep (in, out) so the kernel
    computes x @ W + b. Biases are kept 2D (1, out) for TPU-friendly layout.
    """
    sizes = [(113, 128), (128, 64), (64, 32), (32, 1)]
    params = {}
    for i, (fan_in, fan_out) in enumerate(sizes, start=1):
        key, kw, kb = jax.random.split(key, 3)
        bound = 1.0 / jnp.sqrt(fan_in)
        params[f"w{i}"] = jax.random.uniform(
            kw, (fan_in, fan_out), jnp.float32, -bound, bound)
        params[f"b{i}"] = jax.random.uniform(
            kb, (1, fan_out), jnp.float32, -bound, bound)
    return params


def reference_forward(x, params):
    h = jnp.maximum(x @ params["w1"] + params["b1"], 0.0)
    h = jnp.maximum(h @ params["w2"] + params["b2"], 0.0)
    h = jnp.maximum(h @ params["w3"] + params["b3"], 0.0)
    return h @ params["w4"] + params["b4"]


if __name__ == "__main__":
    key = jax.random.PRNGKey(0)
    key, kx = jax.random.split(key)
    B = 24  # small, exercises the 2-tile grid and the ragged (masked) last tile
    x = jax.random.normal(kx, (B, F_IN), jnp.float32)

    params = init_params(key)

    out = sales_volume_predictor(x, params)
    out = jax.block_until_ready(out)

    ref = reference_forward(x, params)
    assert out.shape == (B, 1), out.shape
    assert jnp.allclose(out, ref, atol=1e-3, rtol=1e-3), "mismatch vs reference"

    print("KERNEL_OK")
</pallas_src>

<mosaic_0001>
module attributes {stable_mosaic.version = 11 : i64} {
  func.func @mlp_kernel(%arg0: i32, %arg1: memref<16x113xf32, #tpu.memory_space<vmem>>, %arg2: memref<113x128xf32, #tpu.memory_space<vmem>>, %arg3: memref<1x128xf32, #tpu.memory_space<vmem>>, %arg4: memref<128x64xf32, #tpu.memory_space<vmem>>, %arg5: memref<1x64xf32, #tpu.memory_space<vmem>>, %arg6: memref<64x32xf32, #tpu.memory_space<vmem>>, %arg7: memref<1x32xf32, #tpu.memory_space<vmem>>, %arg8: memref<1x32xf32, #tpu.memory_space<vmem>>, %arg9: memref<1x1xf32, #tpu.memory_space<smem>>, %arg10: memref<16x1xf32, #tpu.memory_space<vmem>>) attributes {dimension_semantics = [#tpu.dimension_semantics<parallel>], iteration_bounds = array<i64: 2>, scalar_prefetch = 0 : i64, scratch_operands = 0 : i64, tpu.core_type = #tpu.core_type<tc>, window_params = [{transform_indices = @transform_0, window_bounds = array<i64: 16, 113>}, {pipeline_mode = #tpu.pipeline_mode<synchronous>, transform_indices = @transform_1, window_bounds = array<i64: 113, 128>}, {pipeline_mode = #tpu.pipeline_mode<synchronous>, transform_indices = @transform_2, window_bounds = array<i64: 1, 128>}, {pipeline_mode = #tpu.pipeline_mode<synchronous>, transform_indices = @transform_3, window_bounds = array<i64: 128, 64>}, {pipeline_mode = #tpu.pipeline_mode<synchronous>, transform_indices = @transform_4, window_bounds = array<i64: 1, 64>}, {pipeline_mode = #tpu.pipeline_mode<synchronous>, transform_indices = @transform_5, window_bounds = array<i64: 64, 32>}, {pipeline_mode = #tpu.pipeline_mode<synchronous>, transform_indices = @transform_6, window_bounds = array<i64: 1, 32>}, {pipeline_mode = #tpu.pipeline_mode<synchronous>, transform_indices = @transform_7, window_bounds = array<i64: 1, 32>}, {transform_indices = @transform_8, window_bounds = array<i64: 1, 1>}, {transform_indices = @transform_9, window_bounds = array<i64: 16, 1>}]} {
    %c0 = arith.constant 0 : index
    %c0_0 = arith.constant 0 : index
    %0 = vector.load %arg1[%c0, %c0_0] : memref<16x113xf32, #tpu.memory_space<vmem>>, vector<16x113xf32>
    %c0_1 = arith.constant 0 : index
    %c0_2 = arith.constant 0 : index
    %1 = vector.load %arg2[%c0_1, %c0_2] : memref<113x128xf32, #tpu.memory_space<vmem>>, vector<113x128xf32>
    %cst = arith.constant dense<0.000000e+00> : vector<16x128xf32>
    %2 = tpu.matmul %0, %1, %cst {dimension_numbers = #tpu.dot_dimension_numbers<[1], [0], [0], [1], [0, 0, 1, 1], [], []>} : vector<16x113xf32>, vector<113x128xf32>, vector<16x128xf32> -> vector<16x128xf32>
    %c0_3 = arith.constant 0 : index
    %c0_4 = arith.constant 0 : index
    %3 = vector.load %arg3[%c0_3, %c0_4] : memref<1x128xf32, #tpu.memory_space<vmem>>, vector<1x128xf32>
    %4 = vector.broadcast %3 : vector<1x128xf32> to vector<16x128xf32>
    %5 = arith.addf %2, %4 : vector<16x128xf32>
    %cst_5 = arith.constant 0.000000e+00 : f32
    %6 = vector.broadcast %cst_5 : f32 to vector<16x128xf32>
    %7 = arith.maximumf %5, %6 : vector<16x128xf32>
    %c0_6 = arith.constant 0 : index
    %c0_7 = arith.constant 0 : index
    %8 = vector.load %arg4[%c0_6, %c0_7] : memref<128x64xf32, #tpu.memory_space<vmem>>, vector<128x64xf32>
    %cst_8 = arith.constant dense<0.000000e+00> : vector<16x64xf32>
    %9 = tpu.matmul %7, %8, %cst_8 {dimension_numbers = #tpu.dot_dimension_numbers<[1], [0], [0], [1], [0, 0, 1, 1], [], []>} : vector<16x128xf32>, vector<128x64xf32>, vector<16x64xf32> -> vector<16x64xf32>
    %c0_9 = arith.constant 0 : index
    %c0_10 = arith.constant 0 : index
    %10 = vector.load %arg5[%c0_9, %c0_10] : memref<1x64xf32, #tpu.memory_space<vmem>>, vector<1x64xf32>
    %11 = vector.broadcast %10 : vector<1x64xf32> to vector<16x64xf32>
    %12 = arith.addf %9, %11 : vector<16x64xf32>
    %cst_11 = arith.constant 0.000000e+00 : f32
    %13 = vector.broadcast %cst_11 : f32 to vector<16x64xf32>
    %14 = arith.maximumf %12, %13 : vector<16x64xf32>
    %c0_12 = arith.constant 0 : index
    %c0_13 = arith.constant 0 : index
    %15 = vector.load %arg6[%c0_12, %c0_13] : memref<64x32xf32, #tpu.memory_space<vmem>>, vector<64x32xf32>
    %cst_14 = arith.constant dense<0.000000e+00> : vector<16x32xf32>
    %16 = tpu.matmul %14, %15, %cst_14 {dimension_numbers = #tpu.dot_dimension_numbers<[1], [0], [0], [1], [0, 0, 1, 1], [], []>} : vector<16x64xf32>, vector<64x32xf32>, vector<16x32xf32> -> vector<16x32xf32>
    %c0_15 = arith.constant 0 : index
    %c0_16 = arith.constant 0 : index
    %17 = vector.load %arg7[%c0_15, %c0_16] : memref<1x32xf32, #tpu.memory_space<vmem>>, vector<1x32xf32>
    %18 = vector.broadcast %17 : vector<1x32xf32> to vector<16x32xf32>
    %19 = arith.addf %16, %18 : vector<16x32xf32>
    %cst_17 = arith.constant 0.000000e+00 : f32
    %20 = vector.broadcast %cst_17 : f32 to vector<16x32xf32>
    %21 = arith.maximumf %19, %20 : vector<16x32xf32>
    %c0_18 = arith.constant 0 : index
    %c0_19 = arith.constant 0 : index
    %22 = vector.load %arg8[%c0_18, %c0_19] : memref<1x32xf32, #tpu.memory_space<vmem>>, vector<1x32xf32>
    %23 = vector.broadcast %22 : vector<1x32xf32> to vector<16x32xf32>
    %24 = arith.mulf %21, %23 : vector<16x32xf32>
    %cst_20 = arith.constant dense<0.000000e+00> : vector<16xf32>
    %25 = vector.multi_reduction <add>, %24, %cst_20 [1] : vector<16x32xf32> to vector<16xf32>
    %26 = vector.shape_cast %25 : vector<16xf32> to vector<16x1xf32>
    %c0_21 = arith.constant 0 : index
    %c0_22 = arith.constant 0 : index
    %27 = memref.load %arg9[%c0_21, %c0_22] : memref<1x1xf32, #tpu.memory_space<smem>>
    %28 = vector.broadcast %27 : f32 to vector<16x1xf32>
    %29 = arith.addf %26, %28 : vector<16x1xf32>
    %c0_23 = arith.constant 0 : index
    %c0_24 = arith.constant 0 : index
    %30 = vector.load %arg10[%c0_23, %c0_24] : memref<16x1xf32, #tpu.memory_space<vmem>>, vector<16x1xf32>
    tpu.vector_store %arg10[%c0_23, %c0_24], %29 {strides = array<i32>} : memref<16x1xf32, #tpu.memory_space<vmem>>, vector<16x1xf32>,
    return
  }
  func.func @transform_0(%arg0: i32) -> (i32, i32) {
    %c0_i32 = arith.constant 0 : i32
    %c0_i32_0 = arith.constant 0 : i32
    return %arg0, %c0_i32 : i32, i32
  }
  func.func @transform_1(%arg0: i32) -> (i32, i32) {
    %c0_i32 = arith.constant 0 : i32
    %c0_i32_0 = arith.constant 0 : i32
    %c0_i32_1 = arith.constant 0 : i32
    return %c0_i32, %c0_i32_0 : i32, i32
  }
  func.func @transform_2(%arg0: i32) -> (i32, i32) {
    %c0_i32 = arith.constant 0 : i32
    %c0_i32_0 = arith.constant 0 : i32
    %c0_i32_1 = arith.constant 0 : i32
    return %c0_i32, %c0_i32_0 : i32, i32
  }
  func.func @transform_3(%arg0: i32) -> (i32, i32) {
    %c0_i32 = arith.constant 0 : i32
    %c0_i32_0 = arith.constant 0 : i32
    %c0_i32_1 = arith.constant 0 : i32
    return %c0_i32, %c0_i32_0 : i32, i32
  }
  func.func @transform_4(%arg0: i32) -> (i32, i32) {
    %c0_i32 = arith.constant 0 : i32
    %c0_i32_0 = arith.constant 0 : i32
    %c0_i32_1 = arith.constant 0 : i32
    return %c0_i32, %c0_i32_0 : i32, i32
  }
  func.func @transform_5(%arg0: i32) -> (i32, i32) {
    %c0_i32 = arith.constant 0 : i32
    %c0_i32_0 = arith.constant 0 : i32
    %c0_i32_1 = arith.constant 0 : i32
    return %c0_i32, %c0_i32_0 : i32, i32
  }
  func.func @transform_6(%arg0: i32) -> (i32, i32) {
    %c0_i32 = arith.constant 0 : i32
    %c0_i32_0 = arith.constant 0 : i32
    %c0_i32_1 = arith.constant 0 : i32
    return %c0_i32, %c0_i32_0 : i32, i32
  }
  func.func @transform_7(%arg0: i32) -> (i32, i32) {
    %c0_i32 = arith.constant 0 : i32
    %c0_i32_0 = arith.constant 0 : i32
    %c0_i32_1 = arith.constant 0 : i32
    return %c0_i32, %c0_i32_0 : i32, i32
  }
  func.func @transform_8(%arg0: i32) -> (i32, i32) {
    %c0_i32 = arith.constant 0 : i32
    %c0_i32_0 = arith.constant 0 : i32
    %c0_i32_1 = arith.constant 0 : i32
    return %c0_i32, %c0_i32_0 : i32, i32
  }
  func.func @transform_9(%arg0: i32) -> (i32, i32) {
    %c0_i32 = arith.constant 0 : i32
    %c0_i32_0 = arith.constant 0 : i32
    return %arg0, %c0_i32 : i32, i32
  }
}

</mosaic_0001>

<bundles_post_ra>
// kernel: tpu_custom_call.1
= control target key start
LH: loop header
LB: loop body
LE: loop exit
PB: predicated region body
PF: predicated region fallthrough
CT: control target
= control target key end

     0   :  { %s1524_s0 = inlined_call_operand.vmem [shape: f32[24,113], index: 0, kind: input, shape index: {}]   ;;  %s1525_s1 = inlined_call_operand.vmem [shape: f32[113,128], index: 1, kind: input, shape index: {}]   ;;  %s1526_s2 = inlined_call_operand.vmem [shape: f32[1,128], index: 2, kind: input, shape index: {}]   ;;  %s1527_s3 = inlined_call_operand.vmem [shape: f32[128,64], index: 3, kind: input, shape index: {}]   ;;  %s1528_s4 = inlined_call_operand.vmem [shape: f32[1,64], index: 4, kind: input, shape index: {}]   ;;  %s1529_s5 = inlined_call_operand.vmem [shape: f32[64,32], index: 5, kind: input, shape index: {}]   ;;  %s1530_s6 = inlined_call_operand.vmem [shape: f32[1,32], index: 6, kind: input, shape index: {}]   ;;  %s1531_s7 = inlined_call_operand.vmem [shape: f32[1,32], index: 7, kind: input, shape index: {}]   ;;  %s1532_s8 = inlined_call_operand.<no memory space> [shape: f32[1,1], index: 8, kind: input, shape index: {}]   ;;  %s1533_s9 = inlined_call_operand.vmem [shape: f32[24,1], index: 9, kind: output, shape index: {}]  }
   0x1   :  { %14 = sst [smem:[#allocation2]] %s1532_s8 }
   0x2   :  { %s1306_s11 = smov 0   ;;  %s1308_s12 = smov 0  }
   0x3   :  { %s1310_s13 = smov 0  }
   0x4 LB: > { %s1319_s8 = sadd.s32 4294967295, %s1219_s13   ;;  %s1321_s14 = sadd.s32 1, %s1219_s13   ;;  %s1219_s13 = sphi %s1310_s13, %s1537_s13   ;;  %s1215_s12 = sphi %s1308_s12, %s1536_s12   ;;  %s1211_s11 = sphi %s1306_s11, %s1535_s11  }
   0x5   : > { %s218_s15 = ssub.s32 %s1219_s13, %s1321_s14  ;;  %s221_s16 = sadd.s32 1, %s1215_s12 }
   0x6   : > { %p219_p0 = scmp.eq.s32.totalorder %s218_s15, 0  ;;  %p231_p1 = scmp.ne.s32.totalorder %s1215_s12, %s1211_s11 }
   0x7   : > { %p232_p2 = scmp.eq.s32.totalorder %s1319_s8, 1  ;;  %p912_p3 = scmp.ge.s32.totalorder %s1219_s13, 1 }
   0x8   : > { %s1329_s17 = scalar_select %p219_p0, %s1215_s12, %s221_s16  }
   0x9   : > { %p1331_p4 = por %p232_p2, %p231_p1  ;;  %p297_p5 = scmp.lt.s32.totalorder %s1219_s13, 3 }
   0xb   : > { %p298_p6 = pnand %p912_p3, %p297_p5 }
   0xc   : > { %s1342_s23 = sshll.u32 (!%p298_p6), %s1319_s8, 1  ;;  %s682_s24 = sld [smem:[#allocation2]] (!%p298_p6) }
   0xd   : > { %301 = sbr.rel (%p298_p6) target bundleno = 835 (0x343), region = 56  ;;  %p341_p7 = scmp.lt.s32.totalorder (!%p298_p6), %s1342_s23, 2 }
   0xe   : > { %s333_s25 = sand.u32 (!%p298_p6), 1, %s1211_s11  }
  0x12   : > { %v371_v0 = vld [vmem:[%s1525_s1 + $0x70] sm:$0x1]  ;;  %vm386_vm0 = vcmask 1040384   ;;  %v370_v1 = vld [vmem:[%s1525_s1 + $0x68] sm:$0xff]  ;;  %v369_v2 = vld [vmem:[%s1525_s1 + $0x60] sm:$0xff]  ;;  %s342_s26 = scalar_select %p341_p7, %s1342_s23, 2 }
  0x13   : > { %990 = vmatprep.subr.msk.mxu0 %vm386_vm0, %v371_v0  ;;  %v368_v3 = vld [vmem:[%s1525_s1 + $0x58] sm:$0xff]  ;;  %vm379_vm1 = vcmask 924672   ;;  %v367_v5 = vld [vmem:[%s1525_s1 + $0x50] sm:$0xff]  ;;  %v366_v8 = vld [vmem:[%s1525_s1 + $0x48] sm:$0xff]  ;;  %vm582_vm2 = vcmask 523264   ;;  %vm675_vm3 = vcmask 261120  }
  0x14   : > { %991 = vmatpush3.msk.msra.mxu0 %vm386_vm0, %v371_v0  ;;  %s915_s29 = sshll.u32 %s342_s26, 3  ;;  %v482_v4 = vld [vmem:[%s1527_s3 + $0x78] sm:$0xff]  ;;  %v481_v6 = vld [vmem:[%s1527_s3 + $0x70] sm:$0xff]  ;;  %v480_v9 = vld [vmem:[%s1527_s3 + $0x68] sm:$0xff]  ;;  %vm686_vm4 = vcmask 7168   ;;  %s697_s27 = ssub.s32 (%p1331_p4), 3, %s1342_s23 }
  0x15   : > { %992 = vmatprep.subr.mxu0 %v370_v1  ;;  %s1361_s20 = scalar_lea.vmem %s1524_s0, %s915_s29  ;;  %1023 = vmatprep.subr.mxu1 %v482_v4  ;;  %v365_v10 = vld [vmem:[%s1525_s1 + $0x40] sm:$0xff]  ;;  %v364_v12 = vld [vmem:[%s1525_s1 + $0x38] sm:$0xff]  ;;  %v363_v14 = vld [vmem:[%s1525_s1 + $0x30] sm:$0xff]  ;;  %s942_s11 = sshll.u32 (%p1331_p4), %s1319_s8, 4 }
  0x16   : > { %993 = vmatpush3.msra.mxu0 %v370_v1  ;;  %v355_v7 = vld [vmem:[%s1361_s20] sm:$0xff]  ;;  %1024 = vmatpush3.msra.mxu1 %v482_v4  ;;  %v478_v13 = vld [vmem:[%s1527_s3 + $0x58] sm:$0xff]  ;;  %v477_v15 = vld [vmem:[%s1527_s3 + $0x50] sm:$0xff]  ;;  %p698_p8 = scmp.lt.s32.totalorder (%p1331_p4), %s697_s27, 2  ;;  %s1490_s30 = scalar_lea.vmem (%p1331_p4), %s1533_s9, %s942_s11  }
  0x17   : > { %994 = vmatprep.subr.mxu0 %v369_v2  ;;  %1020 = vmatprep.mubr.msk.f32.mxu0 %vm379_vm1, %v355_v7  ;;  %v479_v11 = vld [vmem:[%s1527_s3 + $0x60] sm:$0xff]  ;;  %v362_v16 = vld [vmem:[%s1525_s1 + $0x28] sm:$0xff]  ;;  %v360_v20 = vld [vmem:[%s1525_s1 + $0x18] sm:$0xff] }
  0x18   : > { %995 = vmatpush3.msra.mxu0 %v369_v2  ;;  %1025 = vmatprep.subr.mxu1 %v481_v6  ;;  %v476_v17 = vld [vmem:[%s1527_s3 + $0x48] sm:$0xff]  ;;  %v361_v18 = vld [vmem:[%s1525_s1 + $0x20] sm:$0xff]  ;;  %v474_v21 = vld [vmem:[%s1527_s3 + $0x38] sm:$0xff] }
  0x19   : > { %996 = vmatprep.subr.mxu0 %v368_v3  ;;  %1026 = vmatpush3.msra.mxu1 %v481_v6  ;;  %v475_v19 = vld [vmem:[%s1527_s3 + $0x40] sm:$0xff]  ;;  %v359_v22 = vld [vmem:[%s1525_s1 + $0x10] sm:$0xff]  ;;  %v358_v24 = vld [vmem:[%s1525_s1 + $0x8] sm:$0xff] }
  0x1a   : > { %997 = vmatpush3.msra.mxu0 %v368_v3  ;;  %1027 = vmatprep.subr.mxu1 %v480_v9  ;;  %v473_v23 = vld [vmem:[%s1527_s3 + $0x30] sm:$0xff]  ;;  %v472_v25 = vld [vmem:[%s1527_s3 + $0x28] sm:$0xff]  ;;  %v357_v26 = vld [vmem:[%s1525_s1] sm:$0xff]  ;;  %v683_v3 = vstv %s682_s24 }
  0x1b   : > { %998 = vmatprep.subr.mxu0 %v367_v5  ;;  %1028 = vmatpush3.msra.mxu1 %v480_v9  ;;  %v471_v27 = vld [vmem:[%s1527_s3 + $0x20] sm:$0xff]  ;;  %v356_v28 = vld [vmem:[%s1361_s20 + $0x8] sm:$0xff]  ;;  %v470_v29 = vld [vmem:[%s1527_s3 + $0x18] sm:$0xff]  ;;  %s913_s20 = sshll.u32 %s333_s25, 4 }
  0x1c   : > { %999 = vmatpush3.msra.mxu0 %v367_v5  ;;  %1029 = vmatprep.subr.mxu1 %v479_v11  ;;  %v469_v30 = vld [vmem:[%s1527_s3 + $0x10] sm:$0xff]  ;;  %v468_v31 = vld [vmem:[%s1527_s3 + $0x8] sm:$0xff]  ;;  %v467_v32 = vld [vmem:[%s1527_s3] sm:$0xff]  ;;  %s1479_s26 = scalar_lea.vmem [#allocation3], %s913_s20  }
  0x1d   : > { %1000 = vmatprep.subr.mxu0 %v366_v8  ;;  %1030 = vmatpush3.msra.mxu1 %v479_v11  ;;  %v574_v33 = vld [vmem:[%s1529_s5 + $0x38] sm:$0xff]  ;;  %v573_v34 = vld [vmem:[%s1529_s5 + $0x30] sm:$0xff]  ;;  %v572_v35 = vld [vmem:[%s1529_s5 + $0x28] sm:$0xff] }
  0x1e   : > { %1001 = vmatpush3.msra.mxu0 %v366_v8  ;;  %1031 = vmatprep.subr.mxu1 %v478_v13  ;;  %v571_v36 = vld [vmem:[%s1529_s5 + $0x20] sm:$0xff]  ;;  %v570_v44 = vld [vmem:[%s1529_s5 + $0x18] sm:$0xff]  ;;  %v569_v45 = vld [vmem:[%s1529_s5 + $0x10] sm:$0xff] }
  0x1f   : > { %1002 = vmatprep.subr.mxu0 %v365_v10  ;;  %1032 = vmatpush3.msra.mxu1 %v478_v13  ;;  %v916_v37 = vld [vmem:[%s1526_s2] ss:$0 sm:$0xff]  ;;  %v568_v46 = vld [vmem:[%s1529_s5 + $0x8] sm:$0xff] }
  0x20   : > { %1003 = vmatpush3.msra.mxu0 %v365_v10  ;;  %1033 = vmatprep.subr.mxu1 %v477_v15  ;;  %v567_v47 = vld [vmem:[%s1529_s5] sm:$0xff] }
  0x21   : > { %1004 = vmatprep.subr.mxu0 %v364_v12  ;;  %1034 = vmatpush3.msra.mxu1 %v477_v15  ;;  %v920_v48 = vld [vmem:[%s1528_s4] ss:$0 sm:$0xff] }
  0x22   : > { %1005 = vmatpush3.msra.mxu0 %v364_v12  ;;  %1035 = vmatprep.subr.mxu1 %v476_v17  ;;  %v921_v55 = vld [vmem:[%s1530_s6] ss:$0 sm:$0xff] }
  0x23   : > { %1006 = vmatprep.subr.mxu0 %v363_v14  ;;  %1036 = vmatpush3.msra.mxu1 %v476_v17  ;;  %v924_v62 = vld [vmem:[%s1531_s7] ss:$0 sm:$0xff] }
  0x24   : > { %1007 = vmatpush3.msra.mxu0 %v363_v14  ;;  %1037 = vmatprep.subr.mxu1 %v475_v19 }
  0x25   : > { %1008 = vmatprep.subr.mxu0 %v362_v16  ;;  %1038 = vmatpush3.msra.mxu1 %v475_v19 }
  0x26   : > { %1009 = vmatpush3.msra.mxu0 %v362_v16  ;;  %1039 = vmatprep.subr.mxu1 %v474_v21 }
  0x27   : > { %1010 = vmatprep.subr.mxu0 %v361_v18  ;;  %1040 = vmatpush3.msra.mxu1 %v474_v21 }
  0x28   : > { %1011 = vmatpush3.msra.mxu0 %v361_v18  ;;  %1041 = vmatprep.subr.mxu1 %v473_v23 }
  0x29   : > { %1012 = vmatprep.subr.mxu0 %v360_v20  ;;  %1042 = vmatpush3.msra.mxu1 %v473_v23 }
  0x2a   : > { %1013 = vmatpush3.msra.mxu0 %v360_v20  ;;  %1043 = vmatprep.subr.mxu1 %v472_v25 }
  0x2b   : > { %1014 = vmatprep.subr.mxu0 %v359_v22  ;;  %1044 = vmatpush3.msra.mxu1 %v472_v25 }
  0x2c   : > { %1015 = vmatpush3.msra.mxu0 %v359_v22  ;;  %1045 = vmatprep.subr.mxu1 %v471_v27 }
  0x2d   : > { %1016 = vmatprep.subr.mxu0 %v358_v24  ;;  %1046 = vmatpush3.msra.mxu1 %v471_v27 }
  0x2e   : > { %1017 = vmatpush3.msra.mxu0 %v358_v24  ;;  %1047 = vmatprep.subr.mxu1 %v470_v29 }
  0x2f   : > { %1018 = vmatprep.subr.mxu0 %v357_v26  ;;  %1048 = vmatpush3.msra.mxu1 %v470_v29 }
  0x30   : > { %1019 = vmatpush3.msra.mxu0 %v357_v26  ;;  %1049 = vmatprep.subr.mxu1 %v469_v30 }
  0x31   : > { %1021 = vmatmul.mubr.msk.f32.vlgmr.msra.gmra.mxu0 %vm379_vm1, %v356_v28  ;;  %1050 = vmatpush3.msra.mxu1 %v469_v30 }
  0x32   : > { %1051 = vmatprep.subr.mxu1 %v468_v31  ;;  %1058 = vmatprep.subr.mxu0 %v574_v33 }
  0x33   : > { %1052 = vmatpush3.msra.mxu1 %v468_v31  ;;  %1059 = vmatpush3.msra.mxu0 %v574_v33 }
  0x34   : > { %1053 = vmatprep.subr.mxu1 %v467_v32  ;;  %1060 = vmatprep.subr.mxu0 %v573_v34 }
  0x35   : > { %1054 = vmatpush3.msra.mxu1 %v467_v32  ;;  %1061 = vmatpush3.msra.mxu0 %v573_v34 }
  0x36   : > { %1062 = vmatprep.subr.mxu0 %v572_v35 }
  0x37   : > { %1063 = vmatpush3.msra.mxu0 %v572_v35 }
  0x38   : > { %1064 = vmatprep.subr.mxu0 %v571_v36 }
  0x39   : > { %1065 = vmatpush3.msra.mxu0 %v571_v36 }
  0x3a   : > { %1066 = vmatprep.subr.mxu0 %v570_v44 }
  0x3b   : > { %1067 = vmatpush3.msra.mxu0 %v570_v44 }
  0x3c   : > { %1068 = vmatprep.subr.mxu0 %v569_v45 }
  0x3d   : > { %1069 = vmatpush3.msra.mxu0 %v569_v45 }
  0x3e   : > { %1070 = vmatprep.subr.mxu0 %v568_v46 }
  0x3f   : > { %1071 = vmatpush3.msra.mxu0 %v568_v46 }
  0x40   : > { %1072 = vmatprep.subr.mxu0 %v567_v47 }
  0x41   : > { %1073 = vmatpush3.msra.mxu0 %v567_v47 }
  0xf1   : > { %v1022_v38 = vpop.f32.mrf.mxu0 }
  0xf2   : > { %v462_v39 = vadd.f32 %v1022_v38, %v916_v37 }
  0xf3   : > { %v456_v40 = vpop.f32.mrf.mxu0 }
  0xf4   : > { %v457_v41 = vadd.f32 %v916_v37, %v456_v40  ;;  %v466_v43 = vmax.f32 %v462_v39, 0.0 }
  0xf6   : > { %v465_v42 = vmax.f32 %v457_v41, 0.0 }
  0xf8   : > { %1055 = vmatprep.mubr.f32.mxu1 %v465_v42 }
  0xf9   : > { %1056 = vmatmul.mubr.f32.vlgmr.msra.gmra.mxu1 %v466_v43 }
 0x1b9   : > { %v1057_v49 = vpop.f32.mrf.mxu1 }
 0x1ba   : > { %v562_v50 = vadd.f32 %v1057_v49, %v920_v48 }
 0x1bb   : > { %v556_v51 = vpop.f32.mrf.mxu1 }
 0x1bc   : > { %v557_v52 = vadd.f32 %v920_v48, %v556_v51  ;;  %v566_v54 = vmax.f32 %v562_v50, 0.0 }
 0x1be   : > { %v565_v53 = vmax.f32 %v557_v52, 0.0 }
 0x1c0   : > { %1074 = vmatprep.mubr.msk.f32.mxu0 %vm582_vm2, %v565_v53 }
 0x1c1   : > { %1075 = vmatmul.mubr.msk.f32.vlgmr.msra.gmra.mxu0 %vm582_vm2, %v566_v54 }
 0x281   : > { %v1076_v56 = vpop.f32.mrf.mxu0 }
 0x282   : > { %v661_v57 = vadd.f32 %v1076_v56, %v921_v55 }
 0x283   : > { %v655_v58 = vpop.f32.mrf.mxu0 }
 0x284   : > { %v656_v59 = vadd.f32 %v921_v55, %v655_v58  ;;  %v665_v60 = vmax.f32 %v661_v57, 0.0 }
 0x286   : > { %v664_v61 = vmax.f32 %v656_v59, 0.0  ;;  %v674_v1 = vmul.f32 %v924_v62, %v665_v60 }
 0x288   : > { %v673_v63 = vmul.f32 %v924_v62, %v664_v61  ;;  %v679_v2 = vsel %vm675_vm3, %v674_v1, 0.0 }
 0x28a   : > { %v676_v0 = vsel %vm675_vm3, %v673_v63, 0.0 }
 0x28b   : > { %677 = vadd.xlane.f32.xlu0 %v676_v0 }
 0x28f   : > { %680 = vadd.xlane.f32.xlu0 %v679_v2 }
 0x314   : > { %v678_v4 = vpop.xlane.xlu0 %677 }
 0x315   : > { %v684_v5 = vadd.f32 %v683_v3, %v678_v4 }
 0x317   : > { %687 = vst.msk [vmem:[%s1479_s26] sm:$0xff] %vm686_vm4, %v684_v5  ;;  %695 = sbr.rel (!%p1331_p4) target bundleno = 835 (0x343), region = 60 }
 0x318   : > { %v681_v6 = vpop.xlane.xlu0 %680 }
 0x319   : > { %v685_v7 = vadd.f32 %v683_v3, %v681_v6 }
 0x31b   : > { %688 = vst.msk [vmem:[%s1479_s26 + $0x8] sm:$0xff] %vm686_vm4, %v685_v7 }
 0x31c   : > { %s1539_s27 = smov (!%p698_p8, %s697_s27), 2 }
 0x31d   : > { %s927_s10 = sshll.u32 %s1539_s27, 7 }
 0x31e   : > { %p930_p9 = scmp.eq.s32.totalorder %s927_s10, 0 }
 0x31f   : > { %s1496_s13 = sshrl.u32 (!%p930_p9), %s1539_s27, 1 }
 0x320   : > { %706 = sbr.rel (%p930_p9) target bundleno = 835 (0x343), region = 64  ;;  %p931_p10 = scmp.le.s32.totalorder (!%p930_p9), %s1496_s13, 0 }
 0x325   : > { %865 = sbr.rel (%p931_p10) target bundleno = 818 (0x332), region = 140  ;;  %s1221_s8 = smov (!%p931_p10), %s1490_s30  }
 0x326   : > { %s1225_s18 = smov (!%p931_p10), %s1479_s26   ;;  %s1229_s23 = smov (!%p931_p10), 0  }
 0x327   : > { %s1233_s15 = smov (!%p931_p10), 0  }
 0x32a LB: >> { %v771_v8 = vld [vmem:[%s1227_s18] sm:$0xff]  ;;  %v773_v9 = vld [vmem:[%s1227_s18 + $0x8] sm:$0xff]  ;;  %s775_s16 = sadd.s32 1, %s1231_s23  ;;  %s765_s15 = sadd.s32 1, %s1235_s15   ;;  %s1235_s15 = sphi %s1233_s15, %s765_s15   ;;  %s1231_s23 = sphi %s1229_s23, %s1230_s23   ;;  %s1227_s18 = sphi %s1225_s18, %s780_s18   ;;  %s1223_s8 = sphi %s1221_s8, %s781_s8  }
 0x32b   : >> { %772 = vst [vmem:[%s1223_s8] sm:$0xff] %v771_v8  ;;  %774 = vst [vmem:[%s1223_s8 + $0x8] sm:$0xff] %v773_v9  ;;  %p776_p11 = scmp.ge.s32.totalorder %s775_s16, %s1496_s13  ;;  %p764_p12 = scmp.ge.s32.totalorder %s765_s15, %s1496_s13 }
 0x32d   : >> { %s1541_s16 = smov (%p776_p11, %s775_s16), 0  ;;  %767 = sbr.rel (!%p764_p12) target bundleno = 810 (0x32a), region = 146 }
 0x32e   : >> { %s932_s19 = sshll.u32 %s1541_s16, 4  ;;  %s1230_s23 = smov %s1541_s16  }
 0x32f   : >> { %s780_s18 = scalar_lea.vmem %s1479_s26, %s932_s19 [#allocation3]   ;;  %s781_s8 = scalar_lea.vmem %s1490_s30, %s932_s19  }
 0x332 PF: > { %s1506_s21 = sand.u32 1, %s1539_s27   ;;  %s943_s22 = sshll.u32 %s1496_s13, 4 }
 0x333   : > { %s786_s24 = scalar_lea.vmem %s1479_s26, %s943_s22 [#allocation3]   ;;  %s788_s25 = scalar_lea.vmem %s1490_s30, %s943_s22  }
 0x334   : > { %p937_p13 = scmp.le.s32.totalorder %s1506_s21, 0 }
 0x335   : > { %s1237_s20 = smov (!%p937_p13), %s788_s25   ;;  %s1241_s11 = smov (!%p937_p13), %s786_s24  }
 0x336   : > { %879 = sbr.rel (%p937_p13) target bundleno = 835 (0x343), region = 151  ;;  %s1245_s28 = smov (!%p937_p13), 0  }
 0x337   : > { %s1249_s29 = smov (!%p937_p13), 0  }
 0x33b LB: >> { %v798_v10 = vld [vmem:[%s1243_s11] sm:$0xff]  ;;  %s800_s27 = sadd.s32 1, %s1247_s28  ;;  %s792_s29 = sadd.s32 1, %s1251_s29   ;;  %s1251_s29 = sphi %s1249_s29, %s792_s29   ;;  %s1247_s28 = sphi %s1245_s28, %s1246_s28   ;;  %s1243_s11 = sphi %s1241_s11, %s805_s11   ;;  %s1239_s20 = sphi %s1237_s20, %s806_s20  }
 0x33c   : >> { %799 = vst [vmem:[%s1239_s20] sm:$0xff] %v798_v10  ;;  %p801_p0 = scmp.ge.s32.totalorder %s800_s27, %s1506_s21  ;;  %p791_p1 = scmp.ge.s32.totalorder %s792_s29, %s1506_s21 }
 0x33e   : >> { %s1543_s27 = smov (%p801_p0, %s800_s27), 0  ;;  %794 = sbr.rel (!%p791_p1) target bundleno = 827 (0x33b), region = 157 }
 0x33f   : >> { %s938_s26 = sshll.u32 %s1543_s27, 3  ;;  %s1246_s28 = smov %s1543_s27  }
 0x340   : >> { %s805_s11 = scalar_lea.vmem %s786_s24, %s938_s26 [#allocation3]   ;;  %s806_s20 = scalar_lea.vmem %s788_s25, %s938_s26  }
 0x343 PF: > { %p17_p2 = scmp.ge.s32.totalorder %s1321_s14, 4   ;;  %s1535_s11 = smov %s1215_s12 }
 0x344   : > { %s1536_s12 = smov %s1329_s17  ;;  %s1537_s13 = smov %s1321_s14 }
 0x345   :  { %19 = sbr.rel (!%p17_p2) target bundleno = 4 (0x4), region = 168 }

</bundles_post_ra>
